<compile_context>
chip_gen: v5e
topology: v5e:2x2
jax: 0.10.0
libtpu: 0.0.40
codegen_flags: <defaults>
</compile_context>

<pallas_src>
import functools

import jax
import jax.numpy as jnp
from jax import lax
from jax.experimental import pallas as pl
from jax.experimental.pallas import tpu as pltpu

SE_RATIO = 4

_HW_CHUNK = 512            # in-kernel streaming chunk (multiple of 128 lanes)
_MiB = 1024 * 1024


def _round_up(x, m):
    return ((x + m - 1) // m) * m


def _vmem_capacity_bytes():
    """Physical VMEM of the local chip; conservative (v7x) fallback."""
    try:
        cap = getattr(pltpu.get_tpu_info(), "vmem_capacity_bytes", None)
        if cap:
            return int(cap)
    except Exception:
        pass
    return 64 * _MiB


# ---------------------------------------------------------------------------
# Fused single-pass kernel: pool + excitation + gate for one (BN, C, HW) block.
# ---------------------------------------------------------------------------
def _se_fused_kernel(x_ref, w1t_ref, b1_ref, a1_ref, w2t_ref, b2_ref, o_ref,
                     pooled_ref, *, inv_hw, n_chunks, hw_tail, tail_off):
    # ---- squeeze: chunked global average pool over the spatial lane axis ----
    pooled_ref[...] = jnp.zeros_like(pooled_ref)

    if n_chunks > 0:
        def pool_body(i, carry):
            off = pl.multiple_of(i * _HW_CHUNK, _HW_CHUNK)
            xc = x_ref[:, :, pl.ds(off, _HW_CHUNK)].astype(jnp.float32)
            pooled_ref[...] += jnp.sum(xc, axis=2)
            return carry
        lax.fori_loop(0, n_chunks, pool_body, 0)
    if hw_tail > 0:
        xt = x_ref[:, :, pl.ds(tail_off, hw_tail)].astype(jnp.float32)
        pooled_ref[...] += jnp.sum(xt, axis=2)

    pooled = pooled_ref[...] * inv_hw                               # (BN, C) f32

    # ---- excitation: (BN,C)@(C,Cr)+b1, PReLU, (BN,Cr)@(Cr,C)+b2, sigmoid ----
    h = jnp.dot(pooled, w1t_ref[...],
                preferred_element_type=jnp.float32) + b1_ref[...]   # (BN, Cr)
    h = jnp.where(h > 0, h, a1_ref[...] * h)                        # PReLU
    z = jnp.dot(h, w2t_ref[...],
                preferred_element_type=jnp.float32) + b2_ref[...]   # (BN, C)
    gate = jax.nn.sigmoid(z)[:, :, None]                            # (BN, C, 1) f32

    # ---- scale: re-stream x_ref (fresh VMEM reads -> bounded live ranges) ----
    if n_chunks > 0:
        def scale_body(i, carry):
            off = pl.multiple_of(i * _HW_CHUNK, _HW_CHUNK)
            xc = x_ref[:, :, pl.ds(off, _HW_CHUNK)]
            o_ref[:, :, pl.ds(off, _HW_CHUNK)] = (xc * gate).astype(o_ref.dtype)
            return carry
        lax.fori_loop(0, n_chunks, scale_body, 0)
    if hw_tail > 0:
        xt = x_ref[:, :, pl.ds(tail_off, hw_tail)]
        o_ref[:, :, pl.ds(tail_off, hw_tail)] = (xt * gate).astype(o_ref.dtype)


# ---------------------------------------------------------------------------
# Two-pass fallback (single image too big for one block): HW-tiled pool kernel
# followed by an HW-tiled excitation+scale kernel.
# ---------------------------------------------------------------------------
def _pool_kernel(x_ref, pooled_ref, acc_ref, *, inv_hw):
    j = pl.program_id(1)

    @pl.when(j == 0)
    def _():
        acc_ref[...] = jnp.zeros_like(acc_ref)

    acc_ref[...] += jnp.sum(x_ref[...].astype(jnp.float32), axis=2)

    @pl.when(j == pl.num_programs(1) - 1)
    def _():
        pooled_ref[...] = (acc_ref[...] * inv_hw)[:, None, :]


def _scale_kernel(pooled_ref, w1t_ref, b1_ref, a1_ref, w2t_ref, b2_ref,
                  x_ref, o_ref):
    pooled = pooled_ref[...][:, 0, :]                               # (1, C) f32
    h = jnp.dot(pooled, w1t_ref[...],
                preferred_element_type=jnp.float32) + b1_ref[...]
    h = jnp.where(h > 0, h, a1_ref[...] * h)
    z = jnp.dot(h, w2t_ref[...],
                preferred_element_type=jnp.float32) + b2_ref[...]
    gate = jax.nn.sigmoid(z)[:, :, None]                            # (1, C, 1)
    o_ref[...] = (x_ref[...] * gate).astype(o_ref.dtype)


# ---------------------------------------------------------------------------
# Block-size selection helpers.
# ---------------------------------------------------------------------------
def _pick_batch_block(n, image_bytes, budget):
    """Largest divisor of n within the VMEM budget, capped at n//2 so the grid
    has >= 2 steps (keeps both v7x TensorCores busy)."""
    cap = n // 2 if n >= 2 else 1
    best = 1
    for bn in range(1, cap + 1):
        if n % bn == 0 and bn * image_bytes <= budget:
            best = bn
    return best


def _pick_hw_tile(hw, c, itemsize, budget):
    """Lane-aligned divisor of hw whose (1, C, THW) block fits the budget."""
    c_pad = _round_up(c, 8)
    lane_divs = [d for d in range(128, hw + 1, 128) if hw % d == 0]
    fitting = [d for d in lane_divs if c_pad * d * itemsize <= budget]
    if fitting:
        return max(fitting)
    if lane_divs:
        return min(lane_divs)
    # TODO(synk): mask a ragged 128-aligned tail when HW has no multiple-of-128
    # divisor instead of falling back to the full spatial extent.
    return hw


# ---------------------------------------------------------------------------
# Wrappers.
# ---------------------------------------------------------------------------
def _se_fused(x2, params, *, BN, inv_hw, image_bytes, params_bytes, capacity,
              donate_input):
    N, C, HW = x2.shape
    w1t, b1r, a1r, w2t, b2r = params
    Cr = w1t.shape[1]
    dtype = x2.dtype

    # Chunk plan for in-kernel streaming over the spatial lane axis.
    if HW > _HW_CHUNK:
        n_chunks = HW // _HW_CHUNK
        tail_off = n_chunks * _HW_CHUNK
        hw_tail = HW - tail_off
    else:
        n_chunks, tail_off, hw_tail = 0, 0, HW

    # in + out blocks double-buffered, plus params, pooled scratch, headroom.
    need = 4 * BN * image_bytes + 2 * params_bytes + BN * C * 4 + 2 * _MiB
    vmem_limit = int(min(capacity, max(need, 16 * _MiB)))

    kernel = functools.partial(_se_fused_kernel, inv_hw=inv_hw,
                               n_chunks=n_chunks, hw_tail=hw_tail,
                               tail_off=tail_off)

    return pl.pallas_call(
        kernel,
        out_shape=jax.ShapeDtypeStruct((N, C, HW), dtype),
        grid_spec=pltpu.PrefetchScalarGridSpec(
            num_scalar_prefetch=0,
            grid=(N // BN,),
            in_specs=[
                pl.BlockSpec((BN, C, HW), lambda n: (n, 0, 0)),   # x
                pl.BlockSpec((C, Cr), lambda n: (0, 0)),          # w1^T
                pl.BlockSpec((1, Cr), lambda n: (0, 0)),          # b1
                pl.BlockSpec((1, Cr), lambda n: (0, 0)),          # prelu alpha
                pl.BlockSpec((Cr, C), lambda n: (0, 0)),          # w2^T
                pl.BlockSpec((1, C), lambda n: (0, 0)),           # b2
            ],
            out_specs=pl.BlockSpec((BN, C, HW), lambda n: (n, 0, 0)),
            scratch_shapes=[pltpu.VMEM((BN, C), jnp.float32)],
        ),
        compiler_params=pltpu.CompilerParams(
            dimension_semantics=("parallel",),
            vmem_limit_bytes=vmem_limit),
        input_output_aliases=({0: 0} if donate_input else {}),
    )(x2, w1t, b1r, a1r, w2t, b2r)


def _se_two_pass(x2, params, *, thw, inv_hw, params_bytes, capacity,
                 donate_input):
    N, C, HW = x2.shape
    w1t, b1r, a1r, w2t, b2r = params
    Cr = w1t.shape[1]
    dtype = x2.dtype
    itemsize = jnp.dtype(dtype).itemsize

    n_hw = HW // thw
    tile_bytes = _round_up(C, 8) * _round_up(thw, 128) * itemsize

    # Pass 1: HW-tiled pool -> (N, 1, C) f32.
    pool_vmem = int(min(capacity,
                        max(2 * tile_bytes + 4 * C * 4 + 2 * _MiB, 16 * _MiB)))
    pooled = pl.pallas_call(
        functools.partial(_pool_kernel, inv_hw=inv_hw),
        out_shape=jax.ShapeDtypeStruct((N, 1, C), jnp.float32),
        grid_spec=pltpu.PrefetchScalarGridSpec(
            num_scalar_prefetch=0,
            grid=(N, n_hw),
            in_specs=[pl.BlockSpec((1, C, thw), lambda i, j: (i, 0, j))],
            out_specs=pl.BlockSpec((1, 1, C), lambda i, j: (i, 0, 0)),
            scratch_shapes=[pltpu.VMEM((1, C), jnp.float32)],
        ),
        compiler_params=pltpu.CompilerParams(
            dimension_semantics=("parallel", "arbitrary"),
            vmem_limit_bytes=pool_vmem),
    )(x2)

    # Pass 2: HW-tiled excitation (tiny, recomputed per tile) + gate multiply.
    scale_vmem = int(min(capacity,
                         max(4 * tile_bytes + 2 * params_bytes + 2 * _MiB,
                             16 * _MiB)))
    out = pl.pallas_call(
        _scale_kernel,
        out_shape=jax.ShapeDtypeStruct((N, C, HW), dtype),
        grid_spec=pltpu.PrefetchScalarGridSpec(
            num_scalar_prefetch=0,
            grid=(N, n_hw),
            in_specs=[
                pl.BlockSpec((1, 1, C), lambda i, j: (i, 0, 0)),    # pooled
                pl.BlockSpec((C, Cr), lambda i, j: (0, 0)),
                pl.BlockSpec((1, Cr), lambda i, j: (0, 0)),
                pl.BlockSpec((1, Cr), lambda i, j: (0, 0)),
                pl.BlockSpec((Cr, C), lambda i, j: (0, 0)),
                pl.BlockSpec((1, C), lambda i, j: (0, 0)),
                pl.BlockSpec((1, C, thw), lambda i, j: (i, 0, j)),  # x
            ],
            out_specs=pl.BlockSpec((1, C, thw), lambda i, j: (i, 0, j)),
        ),
        compiler_params=pltpu.CompilerParams(
            dimension_semantics=("parallel", "parallel"),
            vmem_limit_bytes=scale_vmem),
        input_output_aliases=({6: 0} if donate_input else {}),
    )(pooled, w1t, b1r, a1r, w2t, b2r, x2)
    return out


def se_block(x, w1, b1, alpha, w2, b2, *, donate_input=False,
             block_budget_bytes=None):
    """Squeeze-and-Excitation forward.

    x:     (N, C, H, W)
    w1:    (C//4, C)   1x1-conv weight (squeezed to 2-D)
    b1:    (C//4,)
    alpha: (C//4,)     PReLU per-channel slope
    w2:    (C, C//4)
    b2:    (C,)

    donate_input: alias x into the output.  x is only reshaped (never
    transposed) before the pallas_call, so the alias applies to the caller's
    real buffer on every path and saves one N*C*H*W HBM allocation when the
    caller donates x.
    """
    N, C, H, W = x.shape
    Cr = C // SE_RATIO
    HW = H * W
    dtype = x.dtype
    itemsize = jnp.dtype(dtype).itemsize

    capacity = _vmem_capacity_bytes()
    if block_budget_bytes is None:
        # ~4 MiB per block on v7x (64 MiB VMEM), ~8 MiB on v5e/v6e (128 MiB).
        block_budget_bytes = min(16 * _MiB, max(4 * _MiB, capacity // 16))

    # Native layout: free reshape of contiguous trailing dims -> no extra HBM
    # traffic (the old channels_last transpose cost two full extra passes).
    x2 = x.reshape(N, C, HW)

    # Tiny 1x1-conv params pre-transposed so in-kernel matmuls are row-major
    # (BN,C)@(C,Cr) and (BN,Cr)@(Cr,C); biases / alpha as lane-dense rows.
    w1t = jnp.asarray(w1, jnp.float32).T               # (C, Cr)
    w2t = jnp.asarray(w2, jnp.float32).T               # (Cr, C)
    b1r = jnp.asarray(b1, jnp.float32).reshape(1, Cr)
    a1r = jnp.asarray(alpha, jnp.float32).reshape(1, Cr)
    b2r = jnp.asarray(b2, jnp.float32).reshape(1, C)
    params = (w1t, b1r, a1r, w2t, b2r)
    params_bytes = sum(int(p.size) * 4 for p in params)

    # VMEM footprint of one image's (C, HW) slab after (8, 128) tile padding.
    # TODO(synk): for HW < 128 the lane padding inflates this and stores are
    # masked; a lane-dense (N, C*HW) packing would fix it at the cost of
    # in-kernel relayouts.
    image_bytes = _round_up(C, 8) * _round_up(HW, 128) * itemsize

    if image_bytes <= block_budget_bytes:
        BN = _pick_batch_block(N, image_bytes, block_budget_bytes)
        out = _se_fused(x2, params, BN=BN, inv_hw=1.0 / HW,
                        image_bytes=image_bytes, params_bytes=params_bytes,
                        capacity=capacity, donate_input=donate_input)
    else:
        thw = _pick_hw_tile(HW, C, itemsize, block_budget_bytes)
        out = _se_two_pass(x2, params, thw=thw, inv_hw=1.0 / HW,
                           params_bytes=params_bytes, capacity=capacity,
                           donate_input=donate_input)
    return out.reshape(N, C, H, W)


# ---------------------------------------------------------------------------
# Reference + self-test.
# ---------------------------------------------------------------------------
def se_block_ref(x, w1, b1, alpha, w2, b2):
    """Plain-JAX reference matching the PyTorch forward."""
    pooled = jnp.mean(x, axis=(2, 3))                      # (N, C)
    h = pooled @ w1.T + b1                                 # (N, C//4)
    h = jnp.where(h > 0, h, alpha[None, :] * h)            # PReLU
    g = jax.nn.sigmoid(h @ w2.T + b2)                      # (N, C)
    return x * g[:, :, None, None]


def _run_case(key, N, C, H, W, **kw):
    Cr = C // SE_RATIO
    kx, k1, kb1, k2, kb2 = jax.random.split(key, 5)
    x = jax.random.normal(kx, (N, C, H, W), dtype=jnp.float32)
    w1 = jax.random.normal(k1, (Cr, C), dtype=jnp.float32) * 0.2
    b1 = jax.random.normal(kb1, (Cr,), dtype=jnp.float32) * 0.1
    alpha = jnp.full((Cr,), 0.25, dtype=jnp.float32)       # PyTorch PReLU init
    w2 = jax.random.normal(k2, (C, Cr), dtype=jnp.float32) * 0.2
    b2 = jax.random.normal(kb2, (C,), dtype=jnp.float32) * 0.1

    out = jax.block_until_ready(se_block(x, w1, b1, alpha, w2, b2, **kw))
    ref = se_block_ref(x, w1, b1, alpha, w2, b2)
    assert out.shape == (N, C, H, W)
    assert jnp.allclose(out, ref, atol=1e-5, rtol=1e-5), (
        f"mismatch for shape {(N, C, H, W)} kwargs={kw}")


if __name__ == "__main__":
    key = jax.random.PRNGKey(0)
    k0, k1, k2, k3 = jax.random.split(key, 4)
    # HW >= 128: fused single-pass path (static full-HW chunk), grid of 2.
    _run_case(k0, N=2, C=8, H=16, W=16)
    # HW < 128, C >= 128: native layout, no wrapper transposes anymore.
    _run_case(k1, N=2, C=128, H=7, W=7)
    # HW > 512: exercises the chunked fori_loop pool/scale path plus the tail.
    _run_case(k2, N=2, C=8, H=28, W=28)
    # Tiny budget forces the two-pass (HW-tiled pool + scale) fallback.
    _run_case(k3, N=2, C=8, H=16, W=16, block_budget_bytes=4096)
    print("KERNEL_OK")
</pallas_src>

<mosaic_0001>
module attributes {stable_mosaic.version = 11 : i64} {
  func.func @_se_fused_kernel(%arg0: i32, %arg1: memref<1x8x256xf32, #tpu.memory_space<vmem>>, %arg2: memref<8x2xf32, #tpu.memory_space<vmem>>, %arg3: memref<1x2xf32, #tpu.memory_space<vmem>>, %arg4: memref<1x2xf32, #tpu.memory_space<vmem>>, %arg5: memref<2x8xf32, #tpu.memory_space<vmem>>, %arg6: memref<1x8xf32, #tpu.memory_space<vmem>>, %arg7: memref<1x8x256xf32, #tpu.memory_space<vmem>>, %arg8: memref<1x8xf32, #tpu.memory_space<vmem>>) attributes {dimension_semantics = [#tpu.dimension_semantics<parallel>], iteration_bounds = array<i64: 2>, scalar_prefetch = 0 : i64, scratch_operands = 1 : i64, tpu.core_type = #tpu.core_type<tc>, window_params = [{transform_indices = @transform_0, window_bounds = array<i64: 1, 8, 256>}, {pipeline_mode = #tpu.pipeline_mode<synchronous>, transform_indices = @transform_1, window_bounds = array<i64: 8, 2>}, {pipeline_mode = #tpu.pipeline_mode<synchronous>, transform_indices = @transform_2, window_bounds = array<i64: 1, 2>}, {pipeline_mode = #tpu.pipeline_mode<synchronous>, transform_indices = @transform_3, window_bounds = array<i64: 1, 2>}, {pipeline_mode = #tpu.pipeline_mode<synchronous>, transform_indices = @transform_4, window_bounds = array<i64: 2, 8>}, {pipeline_mode = #tpu.pipeline_mode<synchronous>, transform_indices = @transform_5, window_bounds = array<i64: 1, 8>}, {transform_indices = @transform_6, window_bounds = array<i64: 1, 8, 256>}]} {
    %cst = arith.constant 0.000000e+00 : f32
    %0 = vector.broadcast %cst : f32 to vector<1x8xf32>
    %c0 = arith.constant 0 : index
    %c0_0 = arith.constant 0 : index
    %1 = vector.load %arg8[%c0, %c0_0] : memref<1x8xf32, #tpu.memory_space<vmem>>, vector<1x8xf32>
    tpu.vector_store %arg8[%c0, %c0_0], %0 {strides = array<i32>} : memref<1x8xf32, #tpu.memory_space<vmem>>, vector<1x8xf32>,
    %c0_1 = arith.constant 0 : index
    %c0_2 = arith.constant 0 : index
    %c0_3 = arith.constant 0 : index
    %2 = vector.load %arg1[%c0_1, %c0_2, %c0_3] : memref<1x8x256xf32, #tpu.memory_space<vmem>>, vector<1x8x256xf32>
    %c0_4 = arith.constant 0 : index
    %c0_5 = arith.constant 0 : index
    %3 = vector.load %arg8[%c0_4, %c0_5] : memref<1x8xf32, #tpu.memory_space<vmem>>, vector<1x8xf32>
    %cst_6 = arith.constant dense<0.000000e+00> : vector<1x8xf32>
    %4 = vector.multi_reduction <add>, %2, %cst_6 [2] : vector<1x8x256xf32> to vector<1x8xf32>
    %5 = arith.addf %3, %4 : vector<1x8xf32>
    %c0_7 = arith.constant 0 : index
    %c0_8 = arith.constant 0 : index
    %6 = vector.load %arg8[%c0_7, %c0_8] : memref<1x8xf32, #tpu.memory_space<vmem>>, vector<1x8xf32>
    tpu.vector_store %arg8[%c0_7, %c0_8], %5 {strides = array<i32>} : memref<1x8xf32, #tpu.memory_space<vmem>>, vector<1x8xf32>,
    %c0_9 = arith.constant 0 : index
    %c0_10 = arith.constant 0 : index
    %7 = vector.load %arg8[%c0_9, %c0_10] : memref<1x8xf32, #tpu.memory_space<vmem>>, vector<1x8xf32>
    %cst_11 = arith.constant 3.906250e-03 : f32
    %8 = vector.broadcast %cst_11 : f32 to vector<1x8xf32>
    %9 = arith.mulf %7, %8 : vector<1x8xf32>
    %c0_12 = arith.constant 0 : index
    %c0_13 = arith.constant 0 : index
    %10 = vector.load %arg2[%c0_12, %c0_13] : memref<8x2xf32, #tpu.memory_space<vmem>>, vector<8x2xf32>
    %cst_14 = arith.constant dense<0.000000e+00> : vector<1x2xf32>
    %11 = tpu.matmul %9, %10, %cst_14 {dimension_numbers = #tpu.dot_dimension_numbers<[1], [0], [0], [1], [0, 0, 1, 1], [], []>} : vector<1x8xf32>, vector<8x2xf32>, vector<1x2xf32> -> vector<1x2xf32>
    %c0_15 = arith.constant 0 : index
    %c0_16 = arith.constant 0 : index
    %12 = vector.load %arg3[%c0_15, %c0_16] : memref<1x2xf32, #tpu.memory_space<vmem>>, vector<1x2xf32>
    %13 = arith.addf %11, %12 : vector<1x2xf32>
    %cst_17 = arith.constant 0.000000e+00 : f32
    %14 = vector.broadcast %cst_17 : f32 to vector<1x2xf32>
    %15 = arith.cmpf ogt, %13, %14 : vector<1x2xf32>
    %c0_18 = arith.constant 0 : index
    %c0_19 = arith.constant 0 : index
    %16 = vector.load %arg4[%c0_18, %c0_19] : memref<1x2xf32, #tpu.memory_space<vmem>>, vector<1x2xf32>
    %17 = arith.mulf %16, %13 : vector<1x2xf32>
    %18 = arith.select %15, %13, %17 : vector<1x2xi1>, vector<1x2xf32>
    %c0_20 = arith.constant 0 : index
    %c0_21 = arith.constant 0 : index
    %19 = vector.load %arg5[%c0_20, %c0_21] : memref<2x8xf32, #tpu.memory_space<vmem>>, vector<2x8xf32>
    %cst_22 = arith.constant dense<0.000000e+00> : vector<1x8xf32>
    %20 = tpu.matmul %18, %19, %cst_22 {dimension_numbers = #tpu.dot_dimension_numbers<[1], [0], [0], [1], [0, 0, 1, 1], [], []>} : vector<1x2xf32>, vector<2x8xf32>, vector<1x8xf32> -> vector<1x8xf32>
    %c0_23 = arith.constant 0 : index
    %c0_24 = arith.constant 0 : index
    %21 = vector.load %arg6[%c0_23, %c0_24] : memref<1x8xf32, #tpu.memory_space<vmem>>, vector<1x8xf32>
    %22 = arith.addf %20, %21 : vector<1x8xf32>
    %23 = arith.negf %22 : vector<1x8xf32>
    %24 = math.exp %23 : vector<1x8xf32>
    %cst_25 = arith.constant 1.000000e+00 : f32
    %25 = vector.broadcast %cst_25 : f32 to vector<1x8xf32>
    %26 = arith.addf %25, %24 : vector<1x8xf32>
    %27 = arith.divf %25, %26 : vector<1x8xf32>
    %28 = vector.shape_cast %27 : vector<1x8xf32> to vector<1x8x1xf32>
    %c0_26 = arith.constant 0 : index
    %c0_27 = arith.constant 0 : index
    %c0_28 = arith.constant 0 : index
    %29 = vector.load %arg1[%c0_26, %c0_27, %c0_28] : memref<1x8x256xf32, #tpu.memory_space<vmem>>, vector<1x8x256xf32>
    %30 = vector.broadcast %28 : vector<1x8x1xf32> to vector<1x8x256xf32>
    %31 = arith.mulf %29, %30 : vector<1x8x256xf32>
    %c0_29 = arith.constant 0 : index
    %c0_30 = arith.constant 0 : index
    %c0_31 = arith.constant 0 : index
    %32 = vector.load %arg7[%c0_29, %c0_30, %c0_31] : memref<1x8x256xf32, #tpu.memory_space<vmem>>, vector<1x8x256xf32>
    tpu.vector_store %arg7[%c0_29, %c0_30, %c0_31], %31 {strides = array<i32>} : memref<1x8x256xf32, #tpu.memory_space<vmem>>, vector<1x8x256xf32>,
    return
  }
  func.func @transform_0(%arg0: i32) -> (i32, i32, i32) {
    %c0_i32 = arith.constant 0 : i32
    %c0_i32_0 = arith.constant 0 : i32
    %c0_i32_1 = arith.constant 0 : i32
    return %arg0, %c0_i32, %c0_i32_0 : i32, i32, i32
  }
  func.func @transform_1(%arg0: i32) -> (i32, i32) {
    %c0_i32 = arith.constant 0 : i32
    %c0_i32_0 = arith.constant 0 : i32
    %c0_i32_1 = arith.constant 0 : i32
    return %c0_i32, %c0_i32_0 : i32, i32
  }
  func.func @transform_2(%arg0: i32) -> (i32, i32) {
    %c0_i32 = arith.constant 0 : i32
    %c0_i32_0 = arith.constant 0 : i32
    %c0_i32_1 = arith.constant 0 : i32
    return %c0_i32, %c0_i32_0 : i32, i32
  }
  func.func @transform_3(%arg0: i32) -> (i32, i32) {
    %c0_i32 = arith.constant 0 : i32
    %c0_i32_0 = arith.constant 0 : i32
    %c0_i32_1 = arith.constant 0 : i32
    return %c0_i32, %c0_i32_0 : i32, i32
  }
  func.func @transform_4(%arg0: i32) -> (i32, i32) {
    %c0_i32 = arith.constant 0 : i32
    %c0_i32_0 = arith.constant 0 : i32
    %c0_i32_1 = arith.constant 0 : i32
    return %c0_i32, %c0_i32_0 : i32, i32
  }
  func.func @transform_5(%arg0: i32) -> (i32, i32) {
    %c0_i32 = arith.constant 0 : i32
    %c0_i32_0 = arith.constant 0 : i32
    %c0_i32_1 = arith.constant 0 : i32
    return %c0_i32, %c0_i32_0 : i32, i32
  }
  func.func @transform_6(%arg0: i32) -> (i32, i32, i32) {
    %c0_i32 = arith.constant 0 : i32
    %c0_i32_0 = arith.constant 0 : i32
    %c0_i32_1 = arith.constant 0 : i32
    return %arg0, %c0_i32, %c0_i32_0 : i32, i32, i32
  }
}

</mosaic_0001>

<bundles_post_ra>
// kernel: tpu_custom_call.1
= control target key start
LH: loop header
LB: loop body
LE: loop exit
PB: predicated region body
PF: predicated region fallthrough
CT: control target
= control target key end

     0   :  { %11 = vsyncpa [#allocation4], 0  ;;  %s859_s0 = inlined_call_operand.hbm [shape: f32[2,8,256], index: 0, kind: input, shape index: {}]   ;;  %s860_s1 = inlined_call_operand.vmem [shape: f32[8,2], index: 1, kind: input, shape index: {}]   ;;  %s861_s2 = inlined_call_operand.vmem [shape: f32[1,2], index: 2, kind: input, shape index: {}]   ;;  %s862_s3 = inlined_call_operand.vmem [shape: f32[1,2], index: 3, kind: input, shape index: {}]   ;;  %s863_s4 = inlined_call_operand.vmem [shape: f32[2,8], index: 4, kind: input, shape index: {}]   ;;  %s864_s5 = inlined_call_operand.vmem [shape: f32[1,8], index: 5, kind: input, shape index: {}]   ;;  %s865_s6 = inlined_call_operand.hbm [shape: f32[2,8,256], index: 6, kind: output, shape index: {}]  }
   0x1   :  { %13 = vsyncpa [#allocation4 + $0x1], 0 }
   0x2   :  { %14 = vsyncpa [#allocation5], 0 }
   0x3   :  { %16 = vsyncpa [#allocation5 + $0x1], 0  ;;  %s703_s21 = smov 0   ;;  %s705_s22 = smov 0  }
   0x4   :  { %s707_s23 = smov 0   ;;  %s709_s24 = smov 0  }
   0x5 LB: > { %s724_s25 = sadd.s32 4294967295, %s664_s24   ;;  %s493_s26 = sadd.s32 4294967294, %s664_s24   ;;  %s664_s24 = sphi %s709_s24, %s875_s24   ;;  %s660_s23 = sphi %s707_s23, %s874_s23   ;;  %s656_s22 = sphi %s705_s22, %s873_s22   ;;  %s652_s21 = sphi %s703_s21, %s872_s21  }
   0x6   : > { %s728_s27 = sadd.s32 1, %s664_s24   ;;  %s29_s28 = sadd.s32 1, %s660_s23 }
   0x7   : > { %s26_s29 = ssub.s32 %s664_s24, %s728_s27  ;;  %p36_p0 = scmp.ne.s32.totalorder %s660_s23, %s656_s22 }
   0x8   : > { %p27_p1 = scmp.eq.s32.totalorder %s26_s29, 0  ;;  %p37_p2 = scmp.eq.s32.totalorder %s664_s24, 0 }
   0x9   : > { %p42_p3 = scmp.ne.s32.totalorder %s656_s22, %s652_s21  ;;  %p43_p4 = scmp.eq.s32.totalorder %s724_s25, 0 }
   0xa   : > { %s740_s30 = scalar_select %p27_p1, %s660_s23, %s29_s28  }
   0xb   : > { %p742_p5 = por %p37_p2, %p36_p0  ;;  %p746_p6 = por %p43_p4, %p42_p3 }
   0xc   : > { %p171_p7 = scmp.eq.s32.totalorder %s724_s25, 1  ;;  %p177_p8 = scmp.eq.s32.totalorder %s493_s26, 1 }
   0xd   : > { %p525_p10 = scmp.lt.s32.totalorder %s664_s24, 2  ;;  %s212_s11 = sand.u32 1, %s660_s23  }
   0xe   : > { %p753_p11 = por %p171_p7, %p36_p0  ;;  %p757_p12 = por %p177_p8, %p42_p3 }
   0xf   : > { %s511_s12 = sshll.u32 %s664_s24, 4  ;;  %s496_s13 = sshll.u32 %s212_s11, 4 }
  0x10   : > { %s221_s16 = scalar_lea.hbm %s859_s0, %s511_s12  ;;  %s216_s18 = scalar_lea.vmem [#allocation3], %s496_s13 }
  0x11   : > { %s223_s17 = sshll.u32 %s221_s16, 4  ;;  %s225_s19 = sshll.u32 %s216_s18, 4  ;;  %s224_s17 = int_to_ptr.hbm [resolvable:$true] %s223_s17  ;;  %s226_s19 = int_to_ptr.vmem [resolvable:$true] %s225_s19 }
  0x12   : > { %p768_p13 = pnand %p525_p10, %p742_p5  ;;  %p499_p0 = scmp.ge.s32.totalorder %s664_s24, 1 }
  0x13   : > { %p230_p1 = scmp.lt.s32.totalorder %s664_s24, 3  ;;  %s213_s26 = scalar_lea.sflag [#allocation4], %s212_s11 }
  0x14   : > { %s568_s28 = sshra.s32 %s224_s17, 4  ;;  %p572_p3 = pneg %p768_p13  ;;  %s569_s28 = int_to_ptr.hbm [resolvable:$true] %s568_s28 }
  0x15   : > { %s570_s29 = scalar_lea.hbm %s569_s28, 16  ;;  %s575_s7 = scalar_lea.hbm %s859_s0, 32 }
  0x16   : > { %p571_p2 = scmp.ne.s32.totalorder %s569_s28, %s570_s29  ;;  %p576_p5 = scmp.lt.s32.totalorder %s569_s28, %s859_s0 }
  0x17   : > { %p577_p8 = scmp.lt.s32.totalorder %s575_s7, %s570_s29 }
  0x18   : > { %p573_p4 = pnand %p572_p3, %p571_p2 }
  0x19   : > { %p578_p10 = por %p577_p8, %p576_p5 }
  0x1a   : > { %p574_p7 = pneg %p573_p4 }
  0x1c   : > { %p579_p9 = pnand %p578_p10, %p574_p7 }
  0x1e   : > { %582 = shalt.err (!%p579_p9)
}
  0x1f   : > { %520 = dma.hbm_to_vmem [thread:$0]  (!%p768_p13), %s224_s17, 256, %s226_s19, %s213_s26  }
  0x20   : > { %p231_p2 = pnand %p499_p0, %p230_p1 }
  0x21   : > { %s789_s11 = sand.u32 (!%p231_p2), 1, %s656_s22  }
  0x22   : > { %234 = sbr.rel (%p231_p2) target bundleno = 715 (0x2cb), region = 44  ;;  %s500_s16 = sshll.u32 (!%p231_p2), %s789_s11, 4 }
  0x23   : > { %s237_s18 = scalar_lea.sflag (!%p231_p2), [#allocation4], %s789_s11  ;;  %s240_s28 = scalar_lea.vmem (!%p231_p2), [#allocation3], %s500_s16 }
  0x27   : > { %643 = dma.done.wait (%p746_p6), %s237_s18, 256  }
  0x28   : > { %645 = vsyncadd (%p746_p6), %s237_s18, 4294967040  ;;  %v799_v0 = vld [vmem:[%s240_s28] sm:$0xff]  ;;  %v801_v1 = vld [vmem:[%s240_s28 + $0x8] sm:$0xff]  ;;  %v666_v3 = vmov 0   ;;  %vm270_vm0 = vcmask 57344   ;;  %v667_v4 = vmov 0.0   ;;  %v306_v16 = vlaneseq }
  0x29   : > { %v275_v2 = vadd.f32 %v801_v1, %v799_v0  ;;  %561 = vset.pattern.permute.xlu0 %v666_v3  ;;  %271 = vst.msk [vmem:[#allocation2] sm:$0x1] %vm270_vm0, %v667_v4  ;;  %v314_v15 = vld [vmem:[%s860_s1] sm:$0xff]  ;;  %vm316_vm1 = vcmask 64512   ;;  %vm350_vm2 = vcmask 1041408   ;;  %vm346_vm4 = vcmask 15360  }
  0x2a   : > { %335 = vmatpush.msra.mxu0 %v314_v15  ;;  %v307_v17 = vand.u32 127, %v306_v16  ;;  %v344_v24 = vld [vmem:[%s863_s4] sm:$0x3]  ;;  %v395_v31 = vshrl.u32 %v306_v16, 7  ;;  %s512_s15 = sshll.u32 %s724_s25, 4  ;;  %s269_s17 = scalar_lea.vmem [#allocation6], %s500_s16 }
  0x2b   : > { %276 = vadd.xlane.f32.xlu0 %v275_v2  ;;  %503 = vmatpush.msk.msra.mxu1 %vm350_vm2, %v344_v24  ;;  %v315_v25 = vld [vmem:[%s861_s2] sm:$0x1]  ;;  %s418_s8 = scalar_lea.hbm %s865_s6, %s512_s15  ;;  %s420_s19 = sshll.u32 %s269_s17, 4  ;;  %s421_s19 = int_to_ptr.vmem [resolvable:$true] %s420_s19 }
  0x2c   : > { %v341_v27 = vld [vmem:[%s862_s3] sm:$0x1]  ;;  %562 = vset.pattern.permute.xlu1 %v395_v31  ;;  %s422_s20 = sshll.u32 %s418_s8, 4  ;;  %s407_s26 = scalar_lea.sflag [#allocation5], %s789_s11  ;;  %s423_s20 = int_to_ptr.hbm [resolvable:$true] %s422_s20 }
  0x2d   : > { %v345_v32 = vld [vmem:[%s864_s5] sm:$0x1]  ;;  %s612_s25 = sshra.s32 %s423_s20, 4  ;;  %s618_s13 = scalar_lea.hbm %s865_s6, 32  ;;  %s613_s25 = int_to_ptr.hbm [resolvable:$true] %s612_s25 }
  0x2e   : > { %s614_s29 = scalar_lea.hbm %s613_s25, 16  ;;  %p619_p0 = scmp.lt.s32.totalorder %s613_s25, %s865_s6 }
  0x2f   : > { %p615_p6 = scmp.ne.s32.totalorder %s613_s25, %s614_s29  ;;  %p620_p1 = scmp.lt.s32.totalorder %s618_s13, %s614_s29 }
  0x30   : > { %v274_v19 = vld [vmem:[#allocation2] sm:$0x1] }
  0x31   : > { %p616_p9 = pnand %p615_p6, %p753_p11  ;;  %p621_p3 = por %p620_p1, %p619_p0 }
  0x33   : > { %p617_p13 = pneg %p616_p9 }
  0x35   : > { %p622_p4 = pnand %p621_p3, %p617_p13 }
  0x9e   : > { %v277_v5 = vpop.xlane.xlu0 %276 }
  0x9f   : > { %v279_v6 = vperm.slane %v277_v5, 0  ;;  %v280_v7 = vperm.slane %v277_v5, 1  ;;  %v281_v8 = vperm.slane %v277_v5, 2  ;;  %v282_v9 = vperm.slane %v277_v5, 3 }
  0xa0   : > { %v283_v10 = vperm.slane %v277_v5, 4  ;;  %v284_v11 = vperm.slane %v277_v5, 5  ;;  %v285_v12 = vperm.slane %v277_v5, 6  ;;  %v286_v13 = vperm.slane %v277_v5, 7 }
  0xa1   : > { %287 = vst [vmem:[#allocation1] ss:$9 sm:$0xff] %v279_v6 }
  0xa2   : > { %289 = vst [vmem:[#allocation1 + $0x1] ss:$9 sm:$0xff] %v280_v7 }
  0xa3   : > { %291 = vst [vmem:[#allocation1 + $0x2] ss:$9 sm:$0xff] %v281_v8 }
  0xa4   : > { %293 = vst [vmem:[#allocation1 + $0x3] ss:$9 sm:$0xff] %v282_v9 }
  0xa5   : > { %295 = vst [vmem:[#allocation1 + $0x4] ss:$9 sm:$0xff] %v283_v10 }
  0xa6   : > { %297 = vst [vmem:[#allocation1 + $0x5] ss:$9 sm:$0xff] %v284_v11 }
  0xa7   : > { %299 = vst [vmem:[#allocation1 + $0x6] ss:$9 sm:$0xff] %v285_v12 }
  0xa8   : > { %301 = vst [vmem:[#allocation1 + $0x7] ss:$9 sm:$0xff] %v286_v13 }
  0xaf   : > { %v302_v14 = vld [vmem:[#allocation1] sm:$0xff] }
  0xb0   : > { %304 = vperm.xlu0 %561, %v302_v14  }
  0xb8   : > { %563 = vset.pattern.permute.xlu0 %v395_v31 }
 0x122   : > { %v305_v18 = vpop.permute.xlu0 %304 }
 0x123   : > { %v308_v20 = vperm.slane %v305_v18, %v307_v17 }
 0x125   : > { %v310_v21 = vadd.f32 %v308_v20, %v274_v19 }
 0x127   : > { %311 = vst.msk [vmem:[#allocation2] sm:$0x1] %vm270_vm0, %v310_v21 }
 0x12e   : > { %v312_v22 = vld [vmem:[#allocation2] sm:$0x1] }
 0x12f   : > { %v313_v23 = vmul.f32 0.00390625, %v312_v22 }
 0x131   : > { %502 = vmatmul.msk.f32.vlgmr.msra.gmra.mxu0 %vm316_vm1, %v313_v23 }
 0x1ae   : > { %v337_v26 = vpop.f32.mrf.mxu0 }
 0x1af   : > { %v338_v28 = vadd.f32 %v337_v26, %v315_v25 }
 0x1b1   : > { %v342_v29 = vmul.f32 %v341_v27, %v338_v28  ;;  %vm340_vm3 = vcmp.gt.f32.partialorder %v338_v28, 0.0 }
 0x1b3   : > { %v343_v30 = vsel %vm340_vm3, %v338_v28, %v342_v29 }
 0x1b4   : > { %504 = vmatmul.msk.f32.vlgmr.msra.gmra.mxu1 %vm346_vm4, %v343_v30 }
 0x231   : > { %v371_v33 = vpop.f32.mrf.mxu1 }
 0x232   : > { %v372_v34 = vadd.f32 %v371_v33, %v345_v32 }
 0x234   : > { %v505_v35 = vmul.f32 -1.442695, %v372_v34 }
 0x236   : > { %564 = vpow2.f32 %v505_v35 }
 0x23c   : > { %v565_v36 = vpop.eup %564 }
 0x23d   : > { %v377_v37 = vadd.f32 1.0, %v565_v36 }
 0x23f   : > { %566 = vrcp.f32 %v377_v37  ;;  %v389_v41 = vand.u32 2147483648, %v377_v37  ;;  %v387_v43 = vand.u32 2147483647, %v377_v37  ;;  %vm383_vm6 = vweird.f32 %v377_v37 }
 0x241   : > { %v390_v45 = vor.u32 1.1754944e-38, %v389_v41  ;;  %vm388_vm8 = vcmp.eq.f32.partialorder %v387_v43, 8.507059e+37 }
 0x245   : > { %v567_v38 = vpop.eup %566 }
 0x246   : > { %v379_v39 = vmul.f32 %v567_v38, %v377_v37  ;;  %vm384_vm5 = vweird.f32 %v567_v38 }
 0x247   : > { %vm385_vm7 = vmor %vm383_vm6, %vm384_vm5 }
 0x248   : > { %v380_v40 = vsub.f32 1.0, %v379_v39 }
 0x24a   : > { %v381_v42 = vmul.f32 %v567_v38, %v380_v40 }
 0x24c   : > { %v382_v44 = vadd.f32 %v567_v38, %v381_v42 }
 0x24e   : > { %v386_v46 = vsel %vm385_vm7, %v567_v38, %v382_v44 }
 0x24f   : > { %v391_v47 = vsel %vm388_vm8, %v390_v45, %v386_v46 }
 0x250   : > { %v393_v48 = vperm.slane %v391_v47, 0 }
 0x252   : > { %398 = vperm.xlu1 %562, %v393_v48  }
 0x2c4   : > { %v399_v49 = vpop.permute.xlu1 %398 }
 0x2c5   : > { %v402_v50 = vmul.f32 %v399_v49, %v799_v0  ;;  %v403_v51 = vmul.f32 %v399_v49, %v801_v1 }
 0x2c7   : > { %404 = vst [vmem:[%s269_s17] sm:$0xff] %v402_v50 }
 0x2c8   : > { %405 = vst [vmem:[%s269_s17 + $0x8] sm:$0xff] %v403_v51 }
 0x2c9   : > { %625 = shalt.err (!%p622_p4)
}
 0x2ca   : > { %515 = dma.vmem_to_hbm [thread:$0]  (%p753_p11), %s421_s19, 256, %s423_s20, %s407_s26  }
 0x2cb PF: > { %s434_s11 = sand.u32 1, %s652_s21   ;;  %p871_p7 = scmp.ge.s32.totalorder %s664_s24, 2 }
 0x2cc   : > { %s435_s15 = scalar_lea.sflag [#allocation5], %s434_s11 }
 0x2cd   : > { %p522_p5 = pnand %p871_p7, %p757_p12 }
 0x2cf   : > { %p523_p8 = pneg %p522_p5 }
 0x2d1   : > { %647 = dma.done.wait (%p523_p8), %s435_s15, 256  }
 0x2d2   : > { %649 = vsyncadd (%p523_p8), %s435_s15, 4294967040  ;;  %p19_p10 = scmp.ge.s32.totalorder %s728_s27, 4   ;;  %s872_s21 = smov %s656_s22 }
 0x2d3   : > { %s873_s22 = smov %s660_s23  ;;  %s874_s23 = smov %s740_s30 }
 0x2d4   : > { %s875_s24 = smov %s728_s27  ;;  %21 = sbr.rel (!%p19_p10) target bundleno = 5 (0x5), region = 96 }
 0x2d9   :  { %441 = vsyncpa [#allocation4], 1 }
 0x2da   :  { %443 = vsyncpa [#allocation4 + $0x1], 1 }
 0x2db   :  { %444 = vsyncpa [#allocation5], 1 }
 0x2dc   :  { %446 = vsyncpa [#allocation5 + $0x1], 1 }

</bundles_post_ra>
